<compile_context>
chip_gen: v6e
topology: v6e:2x2x1
jax: 0.10.0
libtpu: 0.0.40
codegen_flags: <defaults>
</compile_context>

<pallas_src>
import jax
import jax.numpy as jnp
from jax.experimental import pallas as pl
from jax.experimental.pallas import tpu as pltpu

INPUT_SIZE = 784
HIDDEN_SIZE = 500
NUM_CLASSES = 10
PADDED_HIDDEN = 512   # lane-dense hidden dim (4 x 128); pad columns are zero
PADDED_OUT = 128      # lane-dense fc2 output; sliced back to 10 outside


def mlp_kernel(x_ref, w1_ref, b1_ref, w2_ref, b2_ref, o_ref):
    # x_ref:  (TB, 784) f32     w1_ref: (784, 512) bf16   b1_ref: (1, 512) f32
    # w2_ref: (512, 128) bf16   b2_ref: (1, 128)  f32     o_ref:  (TB, 128) f32
    # Cast x to bf16 in-kernel (saves a full external HBM pass over x).
    x = x_ref[...].astype(jnp.bfloat16)
    # fc1: bf16 MXU operands, f32 accumulation; elementwise math in f32
    # (v5e VPU has no bf16 path).
    h = jnp.dot(x, w1_ref[...], preferred_element_type=jnp.float32)
    h = jnp.maximum(h + b1_ref[...], 0.0)
    # fc2: lane-dense K=512, N=128 (padded rows/cols carry zero weights/bias).
    out = jnp.dot(h.astype(jnp.bfloat16), w2_ref[...],
                  preferred_element_type=jnp.float32)
    o_ref[...] = (out + b2_ref[...]).astype(o_ref.dtype)


def prepare_params(w1, b1, w2, b2):
    """One-time layout prep (hoisted off the per-call path).

    PyTorch layout in:  w1 (500, 784), b1 (500,), w2 (10, 500), b2 (10,).
    Returns (in, out)-layout bf16 weights; hidden padded to 512, fc2 output
    padded to 128 lanes.  All pad entries are zero (required for correctness).
    """
    w1_t = jnp.zeros((INPUT_SIZE, PADDED_HIDDEN), jnp.bfloat16)
    w1_t = w1_t.at[:, :HIDDEN_SIZE].set(jnp.asarray(w1).T.astype(jnp.bfloat16))

    b1_2d = jnp.zeros((1, PADDED_HIDDEN), jnp.float32)
    b1_2d = b1_2d.at[:, :HIDDEN_SIZE].set(
        jnp.asarray(b1, jnp.float32).reshape(1, HIDDEN_SIZE))

    w2_t = jnp.zeros((PADDED_HIDDEN, PADDED_OUT), jnp.bfloat16)
    w2_t = w2_t.at[:HIDDEN_SIZE, :NUM_CLASSES].set(
        jnp.asarray(w2).T.astype(jnp.bfloat16))

    b2_2d = jnp.zeros((1, PADDED_OUT), jnp.float32)
    b2_2d = b2_2d.at[:, :NUM_CLASSES].set(
        jnp.asarray(b2, jnp.float32).reshape(1, NUM_CLASSES))
    return w1_t, b1_2d, w2_t, b2_2d


def _round_up(x, m):
    return (x + m - 1) // m * m


def _default_tile_b(B):
    """Largest batch tile, capped at 512 rows.

    512-row f32 x tile = ~1.6 MB (x2 double-buffered) + ~2 MB resident weights
    fits v5e's 16 MiB scoped-VMEM default with room to spare; no ">= 2 grid
    steps" constraint (pointless on single-TC v5e/v6e).  On v7x pass tile_b
    explicitly if you want the grid length to be a multiple of 2 for even
    TensorCore load balance.
    """
    if B <= 512:
        return _round_up(max(B, 16), 16)   # single step, sublane/MXU aligned
    for cand in (512, 256, 128):           # multiples of 128 keep the MXU fed
        if B % cand == 0:
            return cand
    return 512                             # batch gets zero-padded up to tile


def mlp_forward(x, w1_t, b1_2d, w2_t, b2_2d, *, tile_b=None):
    """x: (B, 784) float32. Params from prepare_params(). Returns (B, 10) f32."""
    B, D = x.shape
    assert D == INPUT_SIZE
    if tile_b is None:
        tile_b = _default_tile_b(B)

    # Pad batch to a multiple of the tile (zero rows; sliced off at the end).
    B_pad = _round_up(B, tile_b)
    if B_pad != B:
        x = jnp.pad(x, ((0, B_pad - B), (0, 0)))
    grid = (B_pad // tile_b,)

    cost = pl.CostEstimate(
        flops=2 * B_pad * (INPUT_SIZE * PADDED_HIDDEN + PADDED_HIDDEN * PADDED_OUT),
        transcendentals=0,
        bytes_accessed=(x.size * 4                      # f32 x streamed once
                        + w1_t.size * 2 + w2_t.size * 2  # bf16 weights
                        + b1_2d.size * 4 + b2_2d.size * 4
                        + B_pad * PADDED_OUT * 4),       # f32 output
    )

    out_padded = pl.pallas_call(
        mlp_kernel,
        out_shape=jax.ShapeDtypeStruct((B_pad, PADDED_OUT), jnp.float32),
        grid_spec=pltpu.PrefetchScalarGridSpec(
            num_scalar_prefetch=0,
            grid=grid,
            in_specs=[
                pl.BlockSpec((tile_b, INPUT_SIZE), lambda i: (i, 0)),
                pl.BlockSpec((INPUT_SIZE, PADDED_HIDDEN), lambda i: (0, 0)),
                pl.BlockSpec((1, PADDED_HIDDEN), lambda i: (0, 0)),
                pl.BlockSpec((PADDED_HIDDEN, PADDED_OUT), lambda i: (0, 0)),
                pl.BlockSpec((1, PADDED_OUT), lambda i: (0, 0)),
            ],
            out_specs=pl.BlockSpec((tile_b, PADDED_OUT), lambda i: (i, 0)),
        ),
        compiler_params=pltpu.CompilerParams(
            dimension_semantics=("parallel",),
        ),
        cost_estimate=cost,
    )(x, w1_t, b1_2d, w2_t, b2_2d)

    return out_padded[:B, :NUM_CLASSES]


def init_params(key):
    # Deterministic init mimicking PyTorch Linear shapes:
    # fc1.weight (500, 784), fc1.bias (500,), fc2.weight (10, 500), fc2.bias (10,)
    k1, k2, k3, k4 = jax.random.split(key, 4)
    bound1 = 1.0 / jnp.sqrt(INPUT_SIZE)
    bound2 = 1.0 / jnp.sqrt(HIDDEN_SIZE)
    w1 = jax.random.uniform(k1, (HIDDEN_SIZE, INPUT_SIZE), jnp.float32, -bound1, bound1)
    b1 = jax.random.uniform(k2, (HIDDEN_SIZE,), jnp.float32, -bound1, bound1)
    w2 = jax.random.uniform(k3, (NUM_CLASSES, HIDDEN_SIZE), jnp.float32, -bound2, bound2)
    b2 = jax.random.uniform(k4, (NUM_CLASSES,), jnp.float32, -bound2, bound2)
    return w1, b1, w2, b2


def reference_forward(x, w1, b1, w2, b2):
    h = jnp.maximum(x @ w1.T + b1, 0.0)
    return h @ w2.T + b2


if __name__ == "__main__":
    key = jax.random.PRNGKey(0)
    kx, kp = jax.random.split(key)

    B = 8  # small batch (wrapper pads to a 16-row tile internally)
    x = jax.random.normal(kx, (B, INPUT_SIZE), jnp.float32)
    w1, b1, w2, b2 = init_params(kp)

    # One-time parameter layout prep (transpose / pad / bf16 cast).
    w1_t, b1_2d, w2_t, b2_2d = prepare_params(w1, b1, w2, b2)

    out = mlp_forward(x, w1_t, b1_2d, w2_t, b2_2d)
    out = jax.block_until_ready(out)

    ref = reference_forward(x, w1, b1, w2, b2)
    assert out.shape == (B, NUM_CLASSES)
    # Loose tolerance: MXU operands are bf16 (f32 accumulation), reference is f32.
    assert jnp.allclose(out, ref, atol=5e-2, rtol=5e-2), "mismatch vs reference"

    print("KERNEL_OK")
</pallas_src>

<mosaic_0001>
module attributes {stable_mosaic.version = 11 : i64} {
  func.func @mlp_kernel(%arg0: i32, %arg1: memref<16x784xf32, #tpu.memory_space<vmem>>, %arg2: memref<784x512xbf16, #tpu.memory_space<vmem>>, %arg3: memref<1x512xf32, #tpu.memory_space<vmem>>, %arg4: memref<512x128xbf16, #tpu.memory_space<vmem>>, %arg5: memref<1x128xf32, #tpu.memory_space<vmem>>, %arg6: memref<16x128xf32, #tpu.memory_space<vmem>>) attributes {dimension_semantics = [#tpu.dimension_semantics<parallel>], iteration_bounds = array<i64: 1>, scalar_prefetch = 0 : i64, scratch_operands = 0 : i64, tpu.core_type = #tpu.core_type<tc>, window_params = [{transform_indices = @transform_0, window_bounds = array<i64: 16, 784>}, {pipeline_mode = #tpu.pipeline_mode<synchronous>, transform_indices = @transform_1, window_bounds = array<i64: 784, 512>}, {pipeline_mode = #tpu.pipeline_mode<synchronous>, transform_indices = @transform_2, window_bounds = array<i64: 1, 512>}, {pipeline_mode = #tpu.pipeline_mode<synchronous>, transform_indices = @transform_3, window_bounds = array<i64: 512, 128>}, {pipeline_mode = #tpu.pipeline_mode<synchronous>, transform_indices = @transform_4, window_bounds = array<i64: 1, 128>}, {transform_indices = @transform_5, window_bounds = array<i64: 16, 128>}]} {
    %c0 = arith.constant 0 : index
    %c0_0 = arith.constant 0 : index
    %0 = vector.load %arg1[%c0, %c0_0] : memref<16x784xf32, #tpu.memory_space<vmem>>, vector<16x784xf32>
    %1 = arith.truncf %0 : vector<16x784xf32> to vector<16x784xbf16>
    %c0_1 = arith.constant 0 : index
    %c0_2 = arith.constant 0 : index
    %2 = vector.load %arg2[%c0_1, %c0_2] : memref<784x512xbf16, #tpu.memory_space<vmem>>, vector<784x512xbf16>
    %cst = arith.constant dense<0.000000e+00> : vector<16x512xf32>
    %3 = tpu.matmul %1, %2, %cst {dimension_numbers = #tpu.dot_dimension_numbers<[1], [0], [0], [1], [0, 0, 1, 1], [], []>} : vector<16x784xbf16>, vector<784x512xbf16>, vector<16x512xf32> -> vector<16x512xf32>
    %c0_3 = arith.constant 0 : index
    %c0_4 = arith.constant 0 : index
    %4 = vector.load %arg3[%c0_3, %c0_4] : memref<1x512xf32, #tpu.memory_space<vmem>>, vector<1x512xf32>
    %5 = vector.broadcast %4 : vector<1x512xf32> to vector<16x512xf32>
    %6 = arith.addf %3, %5 : vector<16x512xf32>
    %cst_5 = arith.constant 0.000000e+00 : f32
    %7 = vector.broadcast %cst_5 : f32 to vector<16x512xf32>
    %8 = arith.maximumf %6, %7 : vector<16x512xf32>
    %9 = arith.truncf %8 : vector<16x512xf32> to vector<16x512xbf16>
    %c0_6 = arith.constant 0 : index
    %c0_7 = arith.constant 0 : index
    %10 = vector.load %arg4[%c0_6, %c0_7] : memref<512x128xbf16, #tpu.memory_space<vmem>>, vector<512x128xbf16>
    %cst_8 = arith.constant dense<0.000000e+00> : vector<16x128xf32>
    %11 = tpu.matmul %9, %10, %cst_8 {dimension_numbers = #tpu.dot_dimension_numbers<[1], [0], [0], [1], [0, 0, 1, 1], [], []>} : vector<16x512xbf16>, vector<512x128xbf16>, vector<16x128xf32> -> vector<16x128xf32>
    %c0_9 = arith.constant 0 : index
    %c0_10 = arith.constant 0 : index
    %12 = vector.load %arg5[%c0_9, %c0_10] : memref<1x128xf32, #tpu.memory_space<vmem>>, vector<1x128xf32>
    %13 = vector.broadcast %12 : vector<1x128xf32> to vector<16x128xf32>
    %14 = arith.addf %11, %13 : vector<16x128xf32>
    %c0_11 = arith.constant 0 : index
    %c0_12 = arith.constant 0 : index
    %15 = vector.load %arg6[%c0_11, %c0_12] : memref<16x128xf32, #tpu.memory_space<vmem>>, vector<16x128xf32>
    tpu.vector_store %arg6[%c0_11, %c0_12], %14 {strides = array<i32>} : memref<16x128xf32, #tpu.memory_space<vmem>>, vector<16x128xf32>,
    return
  }
  func.func @transform_0(%arg0: i32) -> (i32, i32) {
    %c0_i32 = arith.constant 0 : i32
    %c0_i32_0 = arith.constant 0 : i32
    return %arg0, %c0_i32 : i32, i32
  }
  func.func @transform_1(%arg0: i32) -> (i32, i32) {
    %c0_i32 = arith.constant 0 : i32
    %c0_i32_0 = arith.constant 0 : i32
    %c0_i32_1 = arith.constant 0 : i32
    return %c0_i32, %c0_i32_0 : i32, i32
  }
  func.func @transform_2(%arg0: i32) -> (i32, i32) {
    %c0_i32 = arith.constant 0 : i32
    %c0_i32_0 = arith.constant 0 : i32
    %c0_i32_1 = arith.constant 0 : i32
    return %c0_i32, %c0_i32_0 : i32, i32
  }
  func.func @transform_3(%arg0: i32) -> (i32, i32) {
    %c0_i32 = arith.constant 0 : i32
    %c0_i32_0 = arith.constant 0 : i32
    %c0_i32_1 = arith.constant 0 : i32
    return %c0_i32, %c0_i32_0 : i32, i32
  }
  func.func @transform_4(%arg0: i32) -> (i32, i32) {
    %c0_i32 = arith.constant 0 : i32
    %c0_i32_0 = arith.constant 0 : i32
    %c0_i32_1 = arith.constant 0 : i32
    return %c0_i32, %c0_i32_0 : i32, i32
  }
  func.func @transform_5(%arg0: i32) -> (i32, i32) {
    %c0_i32 = arith.constant 0 : i32
    %c0_i32_0 = arith.constant 0 : i32
    return %arg0, %c0_i32 : i32, i32
  }
}

</mosaic_0001>

<bundles_post_ra>
// kernel: tpu_custom_call.1
= control target key start
LH: loop header
LB: loop body
LE: loop exit
PB: predicated region body
PF: predicated region fallthrough
CT: control target
= control target key end

     0   :  { %10 = vsyncpa [#allocation3], 0  ;;  %s2837_s0 = inlined_call_operand.hbm [shape: f32[16,784], index: 0, kind: input, shape index: {}]   ;;  %s2838_s1 = inlined_call_operand.hbm [shape: bf16[784,512], index: 1, kind: input, shape index: {}]   ;;  %s2839_s2 = inlined_call_operand.hbm [shape: f32[1,512], index: 2, kind: input, shape index: {}]   ;;  %s2840_s3 = inlined_call_operand.hbm [shape: bf16[512,128], index: 3, kind: input, shape index: {}]   ;;  %s2841_s4 = inlined_call_operand.vmem [shape: f32[1,128], index: 4, kind: input, shape index: {}]   ;;  %s2842_s5 = inlined_call_operand.hbm [shape: f32[16,128], index: 5, kind: output, shape index: {}]  }
   0x1   :  { %11 = vsyncpa [#allocation6], 0 }
   0x2   :  { %12 = vsyncpa [#allocation9], 0 }
   0x3   :  { %13 = vsyncpa [#allocation4], 0  ;;  %s2743_s18 = smov [#allocation5]  }
   0x4   :  { %s31_s19 = sshll.u32 %s2743_s18, 4  ;;  %s32_s19 = int_to_ptr.vmem [resolvable:$true] %s31_s19 }
   0x5   :  { %s2643_s20 = scalar_lea.vmem %s32_s19, 25088  ;;  %p2648_p1 = scmp.lt.s32.totalorder %s32_s19, %s32_s19 }
   0x6   :  { %p2644_p0 = scmp.ne.s32.totalorder %s32_s19, %s2643_s20  ;;  %p2649_p2 = scmp.lt.s32.totalorder %s2643_s20, %s2643_s20 }
   0x8   :  { %p2650_p3 = por %p2649_p2, %p2648_p1 }
   0xa   :  { %p2651_p4 = pnand %p2650_p3, %p2644_p0 }
   0xc   :  { %2654 = shalt.err (!%p2651_p4)
}
   0xd   :  { %s2744_s21 = smov 256   ;;  %s2745_s22 = smov 16  }
   0xe   :  { %37 = dma.hbm_to_vmem [thread:$0]  %s2838_s1, 25088, %s32_s19, [#allocation6], %s2744_s21, %s2744_s21, %s2745_s22  }
   0xf   :  { %s2746_s25 = smov [#allocation2]  }
  0x10   :  { %s19_s26 = sshll.u32 %s2746_s25, 4  ;;  %s20_s26 = int_to_ptr.vmem [resolvable:$true] %s19_s26 }
  0x11   :  { %s2663_s27 = scalar_lea.vmem %s20_s26, 1792  ;;  %p2668_p6 = scmp.lt.s32.totalorder %s20_s26, %s20_s26 }
  0x12   :  { %p2664_p5 = scmp.ne.s32.totalorder %s20_s26, %s2663_s27  ;;  %p2669_p7 = scmp.lt.s32.totalorder %s2663_s27, %s2663_s27 }
  0x14   :  { %p2670_p8 = por %p2669_p7, %p2668_p6 }
  0x16   :  { %p2671_p9 = pnand %p2670_p8, %p2664_p5 }
  0x18   :  { %2674 = shalt.err (!%p2671_p9)
}
  0x19   :  { %s2747_s28 = smov 896   ;;  %s2748_s29 = smov 56  }
  0x1a   :  { %25 = dma.hbm_to_vmem [thread:$0]  %s2837_s0, 1792, %s20_s26, [#allocation3], %s2747_s28, %s2747_s28, %s2748_s29  }
  0x1b   :  { %s2749_s7 = smov [#allocation7]   ;;  %s2750_s9 = smov [#allocation8]  }
  0x1c   :  { %s44_s8 = sshll.u32 %s2749_s7, 4  ;;  %s53_s1 = sshll.u32 %s2750_s9, 4  ;;  %s45_s8 = int_to_ptr.vmem [resolvable:$true] %s44_s8  ;;  %s54_s1 = int_to_ptr.vmem [resolvable:$true] %s53_s1 }
  0x1d   :  { %s2683_s10 = scalar_lea.vmem %s45_s8, 64  ;;  %p2688_p11 = scmp.lt.s32.totalorder %s45_s8, %s45_s8 }
  0x1e   :  { %p2684_p10 = scmp.ne.s32.totalorder %s45_s8, %s2683_s10  ;;  %p2689_p12 = scmp.lt.s32.totalorder %s2683_s10, %s2683_s10 }
  0x20   :  { %p2690_p13 = por %p2689_p12, %p2688_p11 }
  0x22   :  { %p2691_p0 = pnand %p2690_p13, %p2684_p10 }
  0x24   :  { %2694 = shalt.err (!%p2691_p0)
}
  0x25   :  { %47 = dma.hbm_to_vmem [thread:$0]  %s2839_s2, 64, %s45_s8, [#allocation6]  }
  0x26   :  { %s2703_s13 = scalar_lea.vmem %s54_s1, 4096  ;;  %p2708_p2 = scmp.lt.s32.totalorder %s54_s1, %s54_s1 }
  0x27   :  { %p2704_p1 = scmp.ne.s32.totalorder %s54_s1, %s2703_s13  ;;  %p2709_p3 = scmp.lt.s32.totalorder %s2703_s13, %s2703_s13 }
  0x29   :  { %p2710_p4 = por %p2709_p3, %p2708_p2 }
  0x2b   :  { %p2711_p5 = pnand %p2710_p4, %p2704_p1 }
  0x2d   :  { %2714 = shalt.err (!%p2711_p5)
}
  0x2e   :  { %s2751_s0 = smov 64   ;;  %s2752_s14 = smov 4  }
  0x2f   :  { %59 = dma.hbm_to_vmem [thread:$0]  %s2840_s3, 4096, %s54_s1, [#allocation9], %s2751_s0, %s2751_s0, %s2752_s14  }
  0x30   :  { %2735 = dma.done.wait [#allocation3], 1792  }
  0x31   :  { %2736 = vsyncadd [#allocation3], 4294965504 }
  0x32   :  { %2737 = dma.done.wait [#allocation6], 25152  }
  0x33   :  { %2738 = vsyncadd [#allocation6], 4294942144 }
  0x34   :  { %2739 = dma.done.wait [#allocation9], 4096  }
  0x35   :  { %2740 = vsyncadd [#allocation9], 4294963200  ;;  %v2309_v0 = vld [vmem:[#allocation5 + $0xe4] ss:$16 sps:$4 sm:$0xff]   ;;  %v2313_v2 = vld [vmem:[#allocation5 + $0xe0] ss:$16 sps:$4 sm:$0xff]  }
  0x36   :  { %v2311_v1 = vld [vmem:[#allocation5 + $0x2e4] ss:$16 sps:$4 sm:$0xff]   ;;  %1298 = vmatprep.subr.bf16.mxu0 %v2309_v0  ;;  %v2314_v3 = vld [vmem:[#allocation5 + $0x2e0] ss:$16 sps:$4 sm:$0xff]   ;;  %v76_v46 = vld [vmem:[#allocation2 + $0x8] sm:$0xff]  ;;  %vm1294_vm0 = vcmask 130048  }
  0x37   :  { %1341 = vmatprep.subr.bf16.mxu1 %v2311_v1  ;;  %v2315_v4 = vld [vmem:[#allocation5 + $0xc4] ss:$16 sps:$4 sm:$0xff]   ;;  %1299 = vmatpush1.bf16.msra.mxu0 %v2313_v2  ;;  %v2319_v6 = vld [vmem:[#allocation5 + $0xc0] ss:$16 sps:$4 sm:$0xff]   ;;  %v78_v48 = vld [vmem:[#allocation2 + $0x18] sm:$0xff]  ;;  %s2754_s17 = smov [#allocation10]  }
  0x38   :  { %1342 = vmatpush1.bf16.msra.mxu1 %v2314_v3  ;;  %v2317_v5 = vld [vmem:[#allocation5 + $0x2c4] ss:$16 sps:$4 sm:$0xff]   ;;  %1300 = vmatprep.subr.bf16.mxu0 %v2315_v4  ;;  %v2320_v7 = vld [vmem:[#allocation5 + $0x2c0] ss:$16 sps:$4 sm:$0xff]   ;;  %s2006_s18 = sshll.u32 %s2754_s17, 4  ;;  %s2007_s18 = int_to_ptr.vmem [resolvable:$true] %s2006_s18 }
  0x39   :  { %1343 = vmatprep.subr.bf16.mxu1 %v2317_v5  ;;  %v2321_v8 = vld [vmem:[#allocation5 + $0xa4] ss:$16 sps:$4 sm:$0xff]   ;;  %v2325_v10 = vld [vmem:[#allocation5 + $0xa0] ss:$16 sps:$4 sm:$0xff]   ;;  %s2715_s19 = scalar_lea.vmem %s2007_s18, 256  ;;  %p2720_p7 = scmp.lt.s32.totalorder %s2007_s18, %s2007_s18 }
  0x3a   :  { %v2323_v9 = vld [vmem:[#allocation5 + $0x2a4] ss:$16 sps:$4 sm:$0xff]   ;;  %v2326_v11 = vld [vmem:[#allocation5 + $0x2a0] ss:$16 sps:$4 sm:$0xff]   ;;  %p2716_p6 = scmp.ne.s32.totalorder %s2007_s18, %s2715_s19  ;;  %p2721_p8 = scmp.lt.s32.totalorder %s2715_s19, %s2715_s19 }
  0x3b   :  { %1301 = vmatpush1.bf16.msra.mxu0 %v2319_v6  ;;  %v2327_v12 = vld [vmem:[#allocation5 + $0x84] ss:$16 sps:$4 sm:$0xff]   ;;  %v2331_v14 = vld [vmem:[#allocation5 + $0x80] ss:$16 sps:$4 sm:$0xff]  }
  0x3c   :  { %1344 = vmatpush1.bf16.msra.mxu1 %v2320_v7  ;;  %1302 = vmatprep.subr.bf16.mxu0 %v2321_v8  ;;  %v2329_v13 = vld [vmem:[#allocation5 + $0x284] ss:$16 sps:$4 sm:$0xff]   ;;  %v2332_v15 = vld [vmem:[#allocation5 + $0x280] ss:$16 sps:$4 sm:$0xff]   ;;  %v82_v7 = vld [vmem:[#allocation2 + $0x38] sm:$0xff]  ;;  %p2722_p9 = por %p2721_p8, %p2720_p7 }
  0x3d   :  { %1345 = vmatprep.subr.bf16.mxu1 %v2323_v9  ;;  %v2333_v16 = vld [vmem:[#allocation5 + $0x64] ss:$16 sps:$4 sm:$0xff]   ;;  %v2337_v18 = vld [vmem:[#allocation5 + $0x60] ss:$16 sps:$4 sm:$0xff]   ;;  %v84_v9 = vld [vmem:[#allocation2 + $0x48] sm:$0xff] }
  0x3e   :  { %v2335_v17 = vld [vmem:[#allocation5 + $0x264] ss:$16 sps:$4 sm:$0xff]   ;;  %v2338_v19 = vld [vmem:[#allocation5 + $0x260] ss:$16 sps:$4 sm:$0xff]   ;;  %p2723_p10 = pnand %p2722_p9, %p2716_p6 }
  0x3f   :  { %1303 = vmatpush1.bf16.msra.mxu0 %v2325_v10  ;;  %v2339_v20 = vld [vmem:[#allocation5 + $0x44] ss:$16 sps:$4 sm:$0xff]   ;;  %v2343_v22 = vld [vmem:[#allocation5 + $0x40] ss:$16 sps:$4 sm:$0xff]  }
  0x40   :  { %1346 = vmatpush1.bf16.msra.mxu1 %v2326_v11  ;;  %1304 = vmatprep.subr.bf16.mxu0 %v2327_v12  ;;  %v2341_v21 = vld [vmem:[#allocation5 + $0x244] ss:$16 sps:$4 sm:$0xff]   ;;  %v2344_v23 = vld [vmem:[#allocation5 + $0x240] ss:$16 sps:$4 sm:$0xff]  }
  0x41   :  { %1347 = vmatprep.subr.bf16.mxu1 %v2329_v13  ;;  %v2345_v24 = vld [vmem:[#allocation5 + $0x24] ss:$16 sps:$4 sm:$0xff]   ;;  %v2349_v26 = vld [vmem:[#allocation5 + $0x20] ss:$16 sps:$4 sm:$0xff]  }
  0x42   :  { %v2347_v25 = vld [vmem:[#allocation5 + $0x224] ss:$16 sps:$4 sm:$0xff]   ;;  %v2350_v27 = vld [vmem:[#allocation5 + $0x220] ss:$16 sps:$4 sm:$0xff]  }
  0x43   :  { %1305 = vmatpush1.bf16.msra.mxu0 %v2331_v14  ;;  %v2351_v28 = vld [vmem:[#allocation5 + $0x4] ss:$16 sps:$4 sm:$0xff]   ;;  %v2355_v30 = vld [vmem:[#allocation5] ss:$16 sps:$4 sm:$0xff]  }
  0x44   :  { %1348 = vmatpush1.bf16.msra.mxu1 %v2332_v15  ;;  %1306 = vmatprep.subr.bf16.mxu0 %v2333_v16  ;;  %v2353_v29 = vld [vmem:[#allocation5 + $0x204] ss:$16 sps:$4 sm:$0xff]   ;;  %v2356_v31 = vld [vmem:[#allocation5 + $0x200] ss:$16 sps:$4 sm:$0xff]  }
  0x45   :  { %1349 = vmatprep.subr.bf16.mxu1 %v2335_v17  ;;  %v2357_v32 = vld [vmem:[#allocation5 + $0x1e4] ss:$16 sps:$4 sm:$0xff]   ;;  %v2361_v34 = vld [vmem:[#allocation5 + $0x1e0] ss:$16 sps:$4 sm:$0xff]   ;;  %v2416_v17 = vld [vmem:[#allocation5 + $0xec] ss:$16 sps:$4 sm:$0xff]  }
  0x46   :  { %v2359_v33 = vld [vmem:[#allocation5 + $0x3e4] ss:$16 sps:$4 sm:$0xff]   ;;  %v2362_v35 = vld [vmem:[#allocation5 + $0x3e0] ss:$16 sps:$4 sm:$0xff]  }
  0x47   :  { %1307 = vmatpush1.bf16.msra.mxu0 %v2337_v18  ;;  %v2363_v36 = vld [vmem:[#allocation5 + $0x1c4] ss:$16 sps:$4 sm:$0xff]   ;;  %v2367_v38 = vld [vmem:[#allocation5 + $0x1c0] ss:$16 sps:$4 sm:$0xff]  }
  0x48   :  { %1350 = vmatpush1.bf16.msra.mxu1 %v2338_v19  ;;  %1308 = vmatprep.subr.bf16.mxu0 %v2339_v20  ;;  %v2365_v37 = vld [vmem:[#allocation5 + $0x3c4] ss:$16 sps:$4 sm:$0xff]   ;;  %v2368_v39 = vld [vmem:[#allocation5 + $0x3c0] ss:$16 sps:$4 sm:$0xff]   ;;  %v88_v20 = vld [vmem:[#allocation2 + $0x68] sm:$0xff] }
  0x49   :  { %1351 = vmatprep.subr.bf16.mxu1 %v2341_v21  ;;  %v2369_v40 = vld [vmem:[#allocation5 + $0x1a4] ss:$16 sps:$4 sm:$0xff]   ;;  %v2373_v42 = vld [vmem:[#allocation5 + $0x1a0] ss:$16 sps:$4 sm:$0xff]   ;;  %v2753_v21 = vmov 0  }
  0x4a   :  { %v2371_v41 = vld [vmem:[#allocation5 + $0x3a4] ss:$16 sps:$4 sm:$0xff]   ;;  %v2374_v43 = vld [vmem:[#allocation5 + $0x3a0] ss:$16 sps:$4 sm:$0xff]  }
  0x4b   :  { %1309 = vmatpush1.bf16.msra.mxu0 %v2343_v22  ;;  %v2375_v44 = vld [vmem:[#allocation5 + $0x184] ss:$16 sps:$4 sm:$0xff]   ;;  %v2379_v50 = vld [vmem:[#allocation5 + $0x180] ss:$16 sps:$4 sm:$0xff]  }
  0x4c   :  { %1352 = vmatpush1.bf16.msra.mxu1 %v2344_v23  ;;  %1310 = vmatprep.subr.bf16.mxu0 %v2345_v24  ;;  %v2377_v45 = vld [vmem:[#allocation5 + $0x384] ss:$16 sps:$4 sm:$0xff]   ;;  %v2380_v51 = vld [vmem:[#allocation5 + $0x380] ss:$16 sps:$4 sm:$0xff]   ;;  %v2414_v24 = vld [vmem:[#allocation5 + $0xe8] ss:$16 sps:$4 sm:$0xff]  }
  0x4d   :  { %1353 = vmatprep.subr.bf16.mxu1 %v2347_v25  ;;  %v83_v47 = vld [vmem:[#allocation2 + $0x40] sm:$0xff]  ;;  %v85_v49 = vld [vmem:[#allocation2 + $0x50] sm:$0xff] }
  0x4e   :  { %v2381_v52 = vld [vmem:[#allocation5 + $0x164] ss:$16 sps:$4 sm:$0xff]   ;;  %v2799_v53 = vpack.c.bf16 %v83_v47, %v76_v46  ;;  %v2801_v54 = vpack.c.bf16 %v85_v49, %v78_v48  ;;  %v2385_v56 = vld [vmem:[#allocation5 + $0x160] ss:$16 sps:$4 sm:$0xff]   ;;  %v2444_v47 = vld [vmem:[#allocation5 + $0x48] ss:$16 sps:$4 sm:$0xff]  }
  0x4f   :  { %1311 = vmatpush1.bf16.msra.mxu0 %v2349_v26  ;;  %v2383_v55 = vld [vmem:[#allocation5 + $0x364] ss:$16 sps:$4 sm:$0xff]   ;;  %v2386_v57 = vld [vmem:[#allocation5 + $0x360] ss:$16 sps:$4 sm:$0xff]   ;;  %v2422_v26 = vld [vmem:[#allocation5 + $0xcc] ss:$16 sps:$4 sm:$0xff]  }
  0x50   :  { %1354 = vmatpush1.bf16.msra.mxu1 %v2350_v27  ;;  %1312 = vmatprep.subr.bf16.mxu0 %v2351_v28  ;;  %v2387_v58 = vld [vmem:[#allocation5 + $0x144] ss:$16 sps:$4 sm:$0xff]   ;;  %v2391_v60 = vld [vmem:[#allocation5 + $0x140] ss:$16 sps:$4 sm:$0xff]   ;;  %v2420_v28 = vld [vmem:[#allocation5 + $0xc8] ss:$16 sps:$4 sm:$0xff]  }
  0x51   :  { %1355 = vmatprep.subr.bf16.mxu1 %v2353_v29  ;;  %1330 = vmatprep.mubr.bf16.mxu0 %v2799_v53  ;;  %v2389_v59 = vld [vmem:[#allocation5 + $0x344] ss:$16 sps:$4 sm:$0xff]   ;;  %v2392_v61 = vld [vmem:[#allocation5 + $0x340] ss:$16 sps:$4 sm:$0xff]   ;;  %v2452_v49 = vld [vmem:[#allocation5 + $0x2c] ss:$16 sps:$4 sm:$0xff]  }
  0x52   :  { %1373 = vmatprep.mubr.bf16.mxu1 %v2801_v54  ;;  %v2393_v62 = vld [vmem:[#allocation5 + $0x124] ss:$16 sps:$4 sm:$0xff]   ;;  %v2397_v0 = vld [vmem:[#allocation5 + $0x120] ss:$16 sps:$4 sm:$0xff]  }
  0x53   :  { %1313 = vmatpush1.bf16.msra.mxu0 %v2355_v30  ;;  %v2395_v63 = vld [vmem:[#allocation5 + $0x324] ss:$16 sps:$4 sm:$0xff]   ;;  %v2398_v1 = vld [vmem:[#allocation5 + $0x320] ss:$16 sps:$4 sm:$0xff]   ;;  %v2428_v30 = vld [vmem:[#allocation5 + $0xac] ss:$16 sps:$4 sm:$0xff]  }
  0x54   :  { %1356 = vmatpush1.bf16.msra.mxu1 %v2356_v31  ;;  %1314 = vmatprep.subr.bf16.mxu0 %v2357_v32  ;;  %v2399_v2 = vld [vmem:[#allocation5 + $0x104] ss:$16 sps:$4 sm:$0xff]   ;;  %v2403_v4 = vld [vmem:[#allocation5 + $0x100] ss:$16 sps:$4 sm:$0xff]   ;;  %v2426_v32 = vld [vmem:[#allocation5 + $0xa8] ss:$16 sps:$4 sm:$0xff]  }
  0x55   :  { %1357 = vmatprep.subr.bf16.mxu1 %v2359_v33  ;;  %v2401_v3 = vld [vmem:[#allocation5 + $0x304] ss:$16 sps:$4 sm:$0xff]   ;;  %v2404_v5 = vld [vmem:[#allocation5 + $0x300] ss:$16 sps:$4 sm:$0xff]  }
  0x56   :  { %v75_v6 = vld [vmem:[#allocation2] sm:$0xff]  ;;  %v77_v8 = vld [vmem:[#allocation2 + $0x10] sm:$0xff] }
  0x57   :  { %1315 = vmatpush2.bf16.msra.mxu0 %v2361_v34  ;;  %v2407_v10 = vld [vmem:[#allocation5 + $0x4e4] ss:$16 sps:$4 sm:$0xff]   ;;  %v2805_v12 = vpack.c.bf16 %v82_v7, %v75_v6  ;;  %v2807_v13 = vpack.c.bf16 %v84_v9, %v77_v8  ;;  %v2405_v14 = vld [vmem:[#allocation5 + $0x4e0] ss:$16 sps:$4 sm:$0xff]   ;;  %v2434_v34 = vld [vmem:[#allocation5 + $0x8c] ss:$16 sps:$4 sm:$0xff]  }
  0x58   :  { %1358 = vmatpush2.bf16.msra.mxu1 %v2362_v35  ;;  %1316 = vmatprep.subr.bf16.mxu0 %v2363_v36  ;;  %v2410_v11 = vld [vmem:[#allocation5 + $0x604] ss:$16 sps:$4 sm:$0xff]   ;;  %v2408_v15 = vld [vmem:[#allocation5 + $0x600] ss:$16 sps:$4 sm:$0xff]   ;;  %v2432_v36 = vld [vmem:[#allocation5 + $0x88] ss:$16 sps:$4 sm:$0xff]  }
  0x59   :  { %1359 = vmatprep.subr.bf16.mxu1 %v2365_v37  ;;  %v2413_v16 = vld [vmem:[#allocation5 + $0x4c4] ss:$16 sps:$4 sm:$0xff]   ;;  %v2411_v18 = vld [vmem:[#allocation5 + $0x4c0] ss:$16 sps:$4 sm:$0xff]   ;;  %v2482_v6 = vld [vmem:[#allocation5 + $0x18c] ss:$16 sps:$4 sm:$0xff]  }
  0x5a   :  { %v81_v19 = vld [vmem:[#allocation2 + $0x30] sm:$0xff]  ;;  %v2480_v8 = vld [vmem:[#allocation5 + $0x188] ss:$16 sps:$4 sm:$0xff]  }
  0x5b   :  { %1317 = vmatpush2.bf16.msra.mxu0 %v2367_v38  ;;  %v2419_v22 = vld [vmem:[#allocation5 + $0x4a4] ss:$16 sps:$4 sm:$0xff]   ;;  %v2812_v23 = vpack.c.bf16 %v88_v20, %v81_v19  ;;  %v2417_v25 = vld [vmem:[#allocation5 + $0x4a0] ss:$16 sps:$4 sm:$0xff]   ;;  %v2440_v38 = vld [vmem:[#allocation5 + $0x6c] ss:$16 sps:$4 sm:$0xff]  }
  0x5c   :  { %1360 = vmatpush2.bf16.msra.mxu1 %v2368_v39  ;;  %1318 = vmatprep.subr.bf16.mxu0 %v2369_v40  ;;  %v2425_v27 = vld [vmem:[#allocation5 + $0x484] ss:$16 sps:$4 sm:$0xff]   ;;  %v2423_v29 = vld [vmem:[#allocation5 + $0x480] ss:$16 sps:$4 sm:$0xff]   ;;  %v2438_v40 = vld [vmem:[#allocation5 + $0x68] ss:$16 sps:$4 sm:$0xff]  }
  0x5d   :  { %1361 = vmatprep.subr.bf16.mxu1 %v2371_v41  ;;  %v2431_v31 = vld [vmem:[#allocation5 + $0x464] ss:$16 sps:$4 sm:$0xff]   ;;  %v2429_v33 = vld [vmem:[#allocation5 + $0x460] ss:$16 sps:$4 sm:$0xff]   ;;  %v80_v41 = vld [vmem:[#allocation2 + $0x28] sm:$0xff] }
  0x5e   :  { %v2437_v35 = vld [vmem:[#allocation5 + $0x444] ss:$16 sps:$4 sm:$0xff]   ;;  %v2435_v37 = vld [vmem:[#allocation5 + $0x440] ss:$16 sps:$4 sm:$0xff]  }
  0x5f   :  { %1319 = vmatpush2.bf16.msra.mxu0 %v2373_v42  ;;  %v2443_v39 = vld [vmem:[#allocation5 + $0x424] ss:$16 sps:$4 sm:$0xff]   ;;  %v2447_v48 = vld [vmem:[#allocation5 + $0x400] ss:$16 sps:$4 sm:$0xff]  }
  0x60   :  { %1362 = vmatpush2.bf16.msra.mxu1 %v2374_v43  ;;  %1320 = vmatprep.subr.bf16.mxu0 %v2375_v44  ;;  %v87_v42 = vld [vmem:[#allocation2 + $0x60] sm:$0xff] }
  0x61   :  { %1363 = vmatprep.subr.bf16.mxu1 %v2377_v45  ;;  %v2441_v43 = vld [vmem:[#allocation5 + $0x420] ss:$16 sps:$4 sm:$0xff]   ;;  %v2817_v44 = vpack.c.bf16 %v87_v42, %v80_v41  ;;  %v2446_v45 = vld [vmem:[#allocation5 + $0x4c] ss:$16 sps:$4 sm:$0xff]   ;;  %v2449_v46 = vld [vmem:[#allocation5 + $0x404] ss:$16 sps:$4 sm:$0xff]  }
  0x62   :  { %v2485_v7 = vld [vmem:[#allocation5 + $0x544] ss:$16 sps:$4 sm:$0xff]   ;;  %v2483_v9 = vld [vmem:[#allocation5 + $0x540] ss:$16 sps:$4 sm:$0xff]   ;;  %v2524_v41 = vld [vmem:[#allocation5 + $0x4ac] ss:$16 sps:$4 sm:$0xff]  }
  0x63   :  { %1321 = vmatpush2.bf16.msra.mxu0 %v2379_v50  ;;  %v2455_v50 = vld [vmem:[#allocation5 + $0x5e4] ss:$16 sps:$4 sm:$0xff]   ;;  %v2495_v19 = vld [vmem:[#allocation5 + $0x500] ss:$16 sps:$4 sm:$0xff]   ;;  %v2527_v42 = vld [vmem:[#allocation5 + $0x26c] ss:$16 sps:$4 sm:$0xff]  }
  0x64   :  { %1364 = vmatpush2.bf16.msra.mxu1 %v2380_v51  ;;  %1322 = vmatprep.subr.bf16.mxu0 %v2381_v52  ;;  %v2450_v51 = vld [vmem:[#allocation5 + $0x28] ss:$16 sps:$4 sm:$0xff]   ;;  %v2453_v52 = vld [vmem:[#allocation5 + $0x5e0] ss:$16 sps:$4 sm:$0xff]  }
  0x65   :  { %1365 = vmatprep.subr.bf16.mxu1 %v2383_v55  ;;  %v2461_v55 = vld [vmem:[#allocation5 + $0x5c4] ss:$16 sps:$4 sm:$0xff]  }
  0x66   :  { %v79_v20 = vld [vmem:[#allocation2 + $0x20] sm:$0xff] }
  0x67   :  { %1323 = vmatpush2.bf16.msra.mxu0 %v2385_v56  ;;  %v2456_v56 = vld [vmem:[#allocation5 + $0x8] ss:$16 sps:$4 sm:$0xff]  }
  0x68   :  { %1366 = vmatpush2.bf16.msra.mxu1 %v2386_v57  ;;  %1324 = vmatprep.subr.bf16.mxu0 %v2387_v58  ;;  %v2459_v57 = vld [vmem:[#allocation5 + $0x5c0] ss:$16 sps:$4 sm:$0xff]   ;;  %v2464_v58 = vld [vmem:[#allocation5 + $0x1ec] ss:$16 sps:$4 sm:$0xff]  }
  0x69   :  { %1367 = vmatprep.subr.bf16.mxu1 %v2389_v59  ;;  %v2467_v59 = vld [vmem:[#allocation5 + $0x5a4] ss:$16 sps:$4 sm:$0xff]  }
  0x6b   :  { %1325 = vmatpush2.bf16.msra.mxu0 %v2391_v60  ;;  %v2462_v60 = vld [vmem:[#allocation5 + $0x1e8] ss:$16 sps:$4 sm:$0xff]  }
  0x6c   :  { %1368 = vmatpush2.bf16.msra.mxu1 %v2392_v61  ;;  %1326 = vmatprep.subr.bf16.mxu0 %v2393_v62  ;;  %v2465_v61 = vld [vmem:[#allocation5 + $0x5a0] ss:$16 sps:$4 sm:$0xff]   ;;  %v2470_v62 = vld [vmem:[#allocation5 + $0x1cc] ss:$16 sps:$4 sm:$0xff]  }
  0x6d   :  { %1369 = vmatprep.subr.bf16.mxu1 %v2395_v63  ;;  %v2473_v63 = vld [vmem:[#allocation5 + $0x584] ss:$16 sps:$4 sm:$0xff]  }
  0x6f   :  { %1327 = vmatpush2.bf16.msra.mxu0 %v2397_v0  ;;  %v2468_v0 = vld [vmem:[#allocation5 + $0x1c8] ss:$16 sps:$4 sm:$0xff]  }
  0x70   :  { %1370 = vmatpush2.bf16.msra.mxu1 %v2398_v1  ;;  %1328 = vmatprep.subr.bf16.mxu0 %v2399_v2  ;;  %v2471_v1 = vld [vmem:[#allocation5 + $0x580] ss:$16 sps:$4 sm:$0xff]   ;;  %v2476_v2 = vld [vmem:[#allocation5 + $0x1ac] ss:$16 sps:$4 sm:$0xff]  }
  0x71   :  { %1371 = vmatprep.subr.bf16.mxu1 %v2401_v3  ;;  %v2479_v3 = vld [vmem:[#allocation5 + $0x564] ss:$16 sps:$4 sm:$0xff]  }
  0x73   :  { %1329 = vmatpush2.bf16.msra.mxu0 %v2403_v4  ;;  %v2474_v4 = vld [vmem:[#allocation5 + $0x1a8] ss:$16 sps:$4 sm:$0xff]  }
  0x74   :  { %1372 = vmatpush2.bf16.msra.mxu1 %v2404_v5  ;;  %1384 = vmatprep.subr.bf16.mxu0 %v2407_v10  ;;  %v2477_v5 = vld [vmem:[#allocation5 + $0x560] ss:$16 sps:$4 sm:$0xff]   ;;  %v2488_v10 = vld [vmem:[#allocation5 + $0x16c] ss:$16 sps:$4 sm:$0xff]  }
  0x75   :  { %1441 = vmatprep.subr.bf16.mxu1 %v2410_v11  ;;  %v2491_v11 = vld [vmem:[#allocation5 + $0x524] ss:$16 sps:$4 sm:$0xff]  }
  0x76   :  { %1331 = vmatmul.mubr.bf16.vlgmr.msra.gmra.mxu0 %v2805_v12 }
  0x77   :  { %1374 = vmatmul.mubr.bf16.vlgmr.msra.gmra.mxu1 %v2807_v13  ;;  %1385 = vmatpush1.bf16.msra.mxu0 %v2405_v14  ;;  %v2486_v14 = vld [vmem:[#allocation5 + $0x168] ss:$16 sps:$4 sm:$0xff]  }
  0x78   :  { %1442 = vmatpush1.bf16.msra.mxu1 %v2408_v15  ;;  %1386 = vmatprep.subr.bf16.mxu0 %v2413_v16  ;;  %v2489_v15 = vld [vmem:[#allocation5 + $0x520] ss:$16 sps:$4 sm:$0xff]   ;;  %v2494_v16 = vld [vmem:[#allocation5 + $0x14c] ss:$16 sps:$4 sm:$0xff]  }
  0x79   :  { %1459 = vmatprep.mubr.bf16.mxu1 %v2753_v21  ;;  %1470 = vmatprep.subr.bf16.mxu1 %v2416_v17  ;;  %v2497_v17 = vld [vmem:[#allocation5 + $0x504] ss:$16 sps:$4 sm:$0xff]  }
  0x7a   :  { %1416 = vmatprep.mubr.bf16.mxu0 %v2817_v44 }
  0x7b   :  { %1387 = vmatpush1.bf16.msra.mxu0 %v2411_v18  ;;  %v2492_v18 = vld [vmem:[#allocation5 + $0x148] ss:$16 sps:$4 sm:$0xff]  }
  0x7c   :  { %1388 = vmatprep.subr.bf16.mxu0 %v2419_v22  ;;  %v86_v22 = vld [vmem:[#allocation2 + $0x58] sm:$0xff] }
  0x7f   :  { %2216 = vmatmul.mubr.msk.bf16.vlgmr.msra.gmra.mxu1 %vm1294_vm0, %v2812_v23  ;;  %1389 = vmatpush1.bf16.msra.mxu0 %v2417_v25  ;;  %v2503_v25 = vld [vmem:[#allocation5 + $0x2ec] ss:$16 sps:$4 sm:$0xff]  }
  0x80   :  { %1471 = vmatpush1.bf16.msra.mxu1 %v2414_v24  ;;  %1390 = vmatprep.subr.bf16.mxu0 %v2425_v27  ;;  %v2500_v24 = vld [vmem:[#allocation5 + $0x12c] ss:$16 sps:$4 sm:$0xff]   ;;  %v2498_v27 = vld [vmem:[#allocation5 + $0x128] ss:$16 sps:$4 sm:$0xff]  }
  0x81   :  { %1472 = vmatprep.subr.bf16.mxu1 %v2422_v26  ;;  %1502 = vmatprep.mubr.bf16.mxu1 %v2799_v53  ;;  %v2458_v53 = vld [vmem:[#allocation5 + $0xc] ss:$16 sps:$4 sm:$0xff]   ;;  %v2820_v26 = vpack.c.bf16 %v86_v22, %v79_v20  ;;  %v2582_v20 = vld [vmem:[#allocation5 + $0x568] ss:$16 sps:$4 sm:$0xff]  }
  0x82   :  { %v2585_v22 = vld [vmem:[#allocation5 + $0x328] ss:$16 sps:$4 sm:$0xff]  }
  0x83   :  { %1391 = vmatpush1.bf16.msra.mxu0 %v2423_v29  ;;  %v2506_v29 = vld [vmem:[#allocation5 + $0x10c] ss:$16 sps:$4 sm:$0xff]  }
  0x84   :  { %1473 = vmatpush1.bf16.msra.mxu1 %v2420_v28  ;;  %1392 = vmatprep.subr.bf16.mxu0 %v2431_v31  ;;  %v2501_v28 = vld [vmem:[#allocation5 + $0x2e8] ss:$16 sps:$4 sm:$0xff]  }
  0x85   :  { %1474 = vmatprep.subr.bf16.mxu1 %v2428_v30  ;;  %v2509_v30 = vld [vmem:[#allocation5 + $0x2cc] ss:$16 sps:$4 sm:$0xff]   ;;  %v2504_v31 = vld [vmem:[#allocation5 + $0x108] ss:$16 sps:$4 sm:$0xff]  }
  0x87   :  { %1393 = vmatpush1.bf16.msra.mxu0 %v2429_v33  ;;  %v2512_v33 = vld [vmem:[#allocation5 + $0x4ec] ss:$16 sps:$4 sm:$0xff]  }
  0x88   :  { %1475 = vmatpush1.bf16.msra.mxu1 %v2426_v32  ;;  %1394 = vmatprep.subr.bf16.mxu0 %v2437_v35  ;;  %v2507_v32 = vld [vmem:[#allocation5 + $0x2c8] ss:$16 sps:$4 sm:$0xff]  }
  0x89   :  { %1476 = vmatprep.subr.bf16.mxu1 %v2434_v34  ;;  %v2515_v34 = vld [vmem:[#allocation5 + $0x2ac] ss:$16 sps:$4 sm:$0xff]   ;;  %v2510_v35 = vld [vmem:[#allocation5 + $0x4e8] ss:$16 sps:$4 sm:$0xff]  }
  0x8b   :  { %1395 = vmatpush1.bf16.msra.mxu0 %v2435_v37  ;;  %v2518_v37 = vld [vmem:[#allocation5 + $0x4cc] ss:$16 sps:$4 sm:$0xff]  }
  0x8c   :  { %1477 = vmatpush1.bf16.msra.mxu1 %v2432_v36  ;;  %1396 = vmatprep.subr.bf16.mxu0 %v2443_v39  ;;  %v2513_v36 = vld [vmem:[#allocation5 + $0x2a8] ss:$16 sps:$4 sm:$0xff]  }
  0x8d   :  { %1478 = vmatprep.subr.bf16.mxu1 %v2440_v38  ;;  %v2521_v38 = vld [vmem:[#allocation5 + $0x28c] ss:$16 sps:$4 sm:$0xff]   ;;  %v2516_v39 = vld [vmem:[#allocation5 + $0x4c8] ss:$16 sps:$4 sm:$0xff]  }
  0x8f   :  { %1397 = vmatpush1.bf16.msra.mxu0 %v2441_v43  ;;  %v2522_v43 = vld [vmem:[#allocation5 + $0x4a8] ss:$16 sps:$4 sm:$0xff]  }
  0x90   :  { %1479 = vmatpush1.bf16.msra.mxu1 %v2438_v40  ;;  %1398 = vmatprep.subr.bf16.mxu0 %v2449_v46  ;;  %v2519_v40 = vld [vmem:[#allocation5 + $0x288] ss:$16 sps:$4 sm:$0xff]   ;;  %v2533_v46 = vld [vmem:[#allocation5 + $0x24c] ss:$16 sps:$4 sm:$0xff]  }
  0x91   :  { %1480 = vmatprep.subr.bf16.mxu1 %v2446_v45  ;;  %v2525_v45 = vld [vmem:[#allocation5 + $0x268] ss:$16 sps:$4 sm:$0xff]  }
  0x93   :  { %1399 = vmatpush1.bf16.msra.mxu0 %v2447_v48  ;;  %v2531_v48 = vld [vmem:[#allocation5 + $0x248] ss:$16 sps:$4 sm:$0xff]  }
  0x94   :  { %1481 = vmatpush1.bf16.msra.mxu1 %v2444_v47  ;;  %1400 = vmatprep.subr.bf16.mxu0 %v2455_v50  ;;  %v2528_v47 = vld [vmem:[#allocation5 + $0x488] ss:$16 sps:$4 sm:$0xff]  }
  0x95   :  { %1482 = vmatprep.subr.bf16.mxu1 %v2452_v49  ;;  %v2536_v49 = vld [vmem:[#allocation5 + $0x46c] ss:$16 sps:$4 sm:$0xff]   ;;  %v2534_v50 = vld [vmem:[#allocation5 + $0x468] ss:$16 sps:$4 sm:$0xff]  }
  0x97   :  { %1401 = vmatpush2.bf16.msra.mxu0 %v2453_v52  ;;  %v2542_v52 = vld [vmem:[#allocation5 + $0x44c] ss:$16 sps:$4 sm:$0xff]  }
  0x98   :  { %1483 = vmatpush1.bf16.msra.mxu1 %v2450_v51  ;;  %1402 = vmatprep.subr.bf16.mxu0 %v2461_v55  ;;  %v2537_v51 = vld [vmem:[#allocation5 + $0x228] ss:$16 sps:$4 sm:$0xff]  }
  0x99   :  { %1484 = vmatprep.subr.bf16.mxu1 %v2458_v53  ;;  %v2545_v53 = vld [vmem:[#allocation5 + $0x20c] ss:$16 sps:$4 sm:$0xff]   ;;  %v2543_v55 = vld [vmem:[#allocation5 + $0x208] ss:$16 sps:$4 sm:$0xff]  }
  0x9b   :  { %1403 = vmatpush2.bf16.msra.mxu0 %v2459_v57  ;;  %v2551_v57 = vld [vmem:[#allocation5 + $0x3ec] ss:$16 sps:$4 sm:$0xff]  }
  0x9c   :  { %1485 = vmatpush1.bf16.msra.mxu1 %v2456_v56  ;;  %1404 = vmatprep.subr.bf16.mxu0 %v2467_v59  ;;  %v2548_v56 = vld [vmem:[#allocation5 + $0x42c] ss:$16 sps:$4 sm:$0xff]   ;;  %v2549_v59 = vld [vmem:[#allocation5 + $0x3e8] ss:$16 sps:$4 sm:$0xff]  }
  0x9d   :  { %1486 = vmatprep.subr.bf16.mxu1 %v2464_v58  ;;  %v2546_v58 = vld [vmem:[#allocation5 + $0x428] ss:$16 sps:$4 sm:$0xff]  }
  0x9f   :  { %1405 = vmatpush2.bf16.msra.mxu0 %v2465_v61  ;;  %v2557_v61 = vld [vmem:[#allocation5 + $0x3cc] ss:$16 sps:$4 sm:$0xff]  }
  0xa0   :  { %1487 = vmatpush2.bf16.msra.mxu1 %v2462_v60  ;;  %1406 = vmatprep.subr.bf16.mxu0 %v2473_v63  ;;  %v2554_v60 = vld [vmem:[#allocation5 + $0x40c] ss:$16 sps:$4 sm:$0xff]   ;;  %v2555_v63 = vld [vmem:[#allocation5 + $0x3c8] ss:$16 sps:$4 sm:$0xff]  }
  0xa1   :  { %1488 = vmatprep.subr.bf16.mxu1 %v2470_v62  ;;  %v2552_v62 = vld [vmem:[#allocation5 + $0x408] ss:$16 sps:$4 sm:$0xff]  }
  0xa3   :  { %1407 = vmatpush2.bf16.msra.mxu0 %v2471_v1  ;;  %v2563_v1 = vld [vmem:[#allocation5 + $0x3ac] ss:$16 sps:$4 sm:$0xff]  }
  0xa4   :  { %1489 = vmatpush2.bf16.msra.mxu1 %v2468_v0  ;;  %1408 = vmatprep.subr.bf16.mxu0 %v2479_v3  ;;  %v2560_v0 = vld [vmem:[#allocation5 + $0x5ec] ss:$16 sps:$4 sm:$0xff]   ;;  %v2561_v3 = vld [vmem:[#allocation5 + $0x3a8] ss:$16 sps:$4 sm:$0xff]  }
  0xa5   :  { %1490 = vmatprep.subr.bf16.mxu1 %v2476_v2  ;;  %v2558_v2 = vld [vmem:[#allocation5 + $0x5e8] ss:$16 sps:$4 sm:$0xff]  }
  0xa7   :  { %1409 = vmatpush2.bf16.msra.mxu0 %v2477_v5  ;;  %v2569_v5 = vld [vmem:[#allocation5 + $0x38c] ss:$16 sps:$4 sm:$0xff]  }
  0xa8   :  { %1491 = vmatpush2.bf16.msra.mxu1 %v2474_v4  ;;  %1410 = vmatprep.subr.bf16.mxu0 %v2485_v7  ;;  %v2566_v4 = vld [vmem:[#allocation5 + $0x5cc] ss:$16 sps:$4 sm:$0xff]   ;;  %v2567_v7 = vld [vmem:[#allocation5 + $0x388] ss:$16 sps:$4 sm:$0xff]  }
  0xa9   :  { %1492 = vmatprep.subr.bf16.mxu1 %v2482_v6  ;;  %v2564_v6 = vld [vmem:[#allocation5 + $0x5c8] ss:$16 sps:$4 sm:$0xff]  }
  0xab   :  { %1411 = vmatpush2.bf16.msra.mxu0 %v2483_v9  ;;  %v2575_v9 = vld [vmem:[#allocation5 + $0x36c] ss:$16 sps:$4 sm:$0xff]  }
  0xac   :  { %1493 = vmatpush2.bf16.msra.mxu1 %v2480_v8  ;;  %1412 = vmatprep.subr.bf16.mxu0 %v2491_v11  ;;  %v2572_v8 = vld [vmem:[#allocation5 + $0x5ac] ss:$16 sps:$4 sm:$0xff]   ;;  %v2573_v11 = vld [vmem:[#allocation5 + $0x368] ss:$16 sps:$4 sm:$0xff]  }
  0xad   :  { %1494 = vmatprep.subr.bf16.mxu1 %v2488_v10  ;;  %v2570_v10 = vld [vmem:[#allocation5 + $0x5a8] ss:$16 sps:$4 sm:$0xff]  }
  0xaf   :  { %1413 = vmatpush2.bf16.msra.mxu0 %v2489_v15  ;;  %v2581_v15 = vld [vmem:[#allocation5 + $0x34c] ss:$16 sps:$4 sm:$0xff]  }
  0xb0   :  { %1495 = vmatpush2.bf16.msra.mxu1 %v2486_v14  ;;  %1414 = vmatprep.subr.bf16.mxu0 %v2497_v17  ;;  %v2578_v14 = vld [vmem:[#allocation5 + $0x58c] ss:$16 sps:$4 sm:$0xff]   ;;  %v2579_v17 = vld [vmem:[#allocation5 + $0x348] ss:$16 sps:$4 sm:$0xff]  }
  0xb1   :  { %1496 = vmatprep.subr.bf16.mxu1 %v2494_v16  ;;  %v2576_v16 = vld [vmem:[#allocation5 + $0x588] ss:$16 sps:$4 sm:$0xff]  }
  0xb3   :  { %1415 = vmatpush2.bf16.msra.mxu0 %v2495_v19  ;;  %v2587_v19 = vld [vmem:[#allocation5 + $0x32c] ss:$16 sps:$4 sm:$0xff]  }
  0xb4   :  { %1497 = vmatpush2.bf16.msra.mxu1 %v2492_v18  ;;  %1513 = vmatprep.subr.bf16.mxu0 %v2503_v25  ;;  %v2584_v18 = vld [vmem:[#allocation5 + $0x56c] ss:$16 sps:$4 sm:$0xff]  }
  0xb5   :  { %1498 = vmatprep.subr.bf16.mxu1 %v2500_v24  ;;  %v2590_v24 = vld [vmem:[#allocation5 + $0x54c] ss:$16 sps:$4 sm:$0xff]  }
  0xb6   :  { %1417 = vmatmul.mubr.bf16.vlgmr.msra.gmra.mxu0 %v2820_v26  ;;  %v2593_v25 = vld [vmem:[#allocation5 + $0x30c] ss:$16 sps:$4 sm:$0xff]  }
  0xb7   :  { %1514 = vmatpush1.bf16.msra.mxu0 %v2501_v28  ;;  %1545 = vmatprep.mubr.bf16.mxu0 %v2801_v54  ;;  %v2530_v54 = vld [vmem:[#allocation5 + $0x48c] ss:$16 sps:$4 sm:$0xff]   ;;  %v2591_v28 = vld [vmem:[#allocation5 + $0x308] ss:$16 sps:$4 sm:$0xff]  }
  0xb8   :  { %1499 = vmatpush2.bf16.msra.mxu1 %v2498_v27  ;;  %1515 = vmatprep.subr.bf16.mxu0 %v2509_v30  ;;  %v2588_v27 = vld [vmem:[#allocation5 + $0x548] ss:$16 sps:$4 sm:$0xff]   ;;  %v2599_v30 = vld [vmem:[#allocation5 + $0x60c] ss:$16 sps:$4 sm:$0xff]  }
  0xb9   :  { %1500 = vmatprep.subr.bf16.mxu1 %v2506_v29  ;;  %v2596_v29 = vld [vmem:[#allocation5 + $0x52c] ss:$16 sps:$4 sm:$0xff]  }
  0xbb   :  { %1516 = vmatpush1.bf16.msra.mxu0 %v2507_v32  ;;  %v2597_v32 = vld [vmem:[#allocation5 + $0x608] ss:$16 sps:$4 sm:$0xff]  }
  0xbc   :  { %1501 = vmatpush2.bf16.msra.mxu1 %v2504_v31  ;;  %1517 = vmatprep.subr.bf16.mxu0 %v2515_v34  ;;  %v2594_v31 = vld [vmem:[#allocation5 + $0x528] ss:$16 sps:$4 sm:$0xff]   ;;  %v2603_v34 = vld [vmem:[#allocation8 + $0x78] sm:$0xff]  }
  0xbd   :  { %1556 = vmatprep.subr.bf16.mxu1 %v2512_v33  ;;  %v2602_v33 = vld [vmem:[#allocation5 + $0x50c] ss:$16 sps:$4 sm:$0xff]  }
  0xbf   :  { %1503 = vmatmul.mubr.bf16.vlgmr.msra.gmra.mxu1 %v2805_v12  ;;  %1518 = vmatpush1.bf16.msra.mxu0 %v2513_v36  ;;  %v2539_v12 = vld [vmem:[#allocation5 + $0x22c] ss:$16 sps:$4 sm:$0xff]  }
  0xc0   :  { %1557 = vmatpush1.bf16.msra.mxu1 %v2510_v35  ;;  %1519 = vmatprep.subr.bf16.mxu0 %v2521_v38  ;;  %v2600_v35 = vld [vmem:[#allocation5 + $0x508] ss:$16 sps:$4 sm:$0xff]   ;;  %v2604_v36 = vld [vmem:[#allocation8 + $0x38] sm:$0xff]  }
  0xc1   :  { %1558 = vmatprep.subr.bf16.mxu1 %v2518_v37  ;;  %1588 = vmatprep.mubr.bf16.mxu1 %v2817_v44  ;;  %v2540_v44 = vld [vmem:[#allocation5 + $0x448] ss:$16 sps:$4 sm:$0xff]  }
  0xc2   :  { %v2605_v37 = vld [vmem:[#allocation8 + $0x70] sm:$0xff]  }
  0xc3   :  { %1520 = vmatpush1.bf16.msra.mxu0 %v2519_v40  ;;  %v2606_v38 = vld [vmem:[#allocation8 + $0x30] sm:$0xff]   ;;  %v2609_v40 = vld [vmem:[#allocation8 + $0x60] sm:$0xff]  }
  0xc4   :  { %1559 = vmatpush1.bf16.msra.mxu1 %v2516_v39  ;;  %1521 = vmatprep.subr.bf16.mxu0 %v2527_v42  ;;  %v2607_v39 = vld [vmem:[#allocation8 + $0x68] sm:$0xff]   ;;  %v2620_v42 = vld [vmem:[#allocation8 + $0xb8] sm:$0xff]  }
  0xc5   :  { %1560 = vmatprep.subr.bf16.mxu1 %v2524_v41  ;;  %v2619_v41 = vld [vmem:[#allocation8 + $0xf8] sm:$0xff]  }
  0xc7   :  { %1522 = vmatpush1.bf16.msra.mxu0 %v2525_v45  ;;  %v2611_v45 = vld [vmem:[#allocation8 + $0x58] sm:$0xff]  }
  0xc8   :  { %1561 = vmatpush1.bf16.msra.mxu1 %v2522_v43  ;;  %1523 = vmatprep.subr.bf16.mxu0 %v2533_v46  ;;  %v2610_v43 = vld [vmem:[#allocation8 + $0x20] sm:$0xff]   ;;  %v2613_v46 = vld [vmem:[#allocation8 + $0x50] sm:$0xff]  }
  0xc9   :  { %1562 = vmatprep.subr.bf16.mxu1 %v2530_v54  ;;  %v2612_v54 = vld [vmem:[#allocation8 + $0x18] sm:$0xff]  }
  0xcb   :  { %1524 = vmatpush1.bf16.msra.mxu0 %v2531_v48  ;;  %v2615_v48 = vld [vmem:[#allocation8 + $0x48] sm:$0xff]  }
  0xcc   :  { %1563 = vmatpush1.bf16.msra.mxu1 %v2528_v47  ;;  %1525 = vmatprep.subr.bf16.mxu0 %v2539_v12  ;;  %v2614_v47 = vld [vmem:[#allocation8 + $0x10] sm:$0xff]   ;;  %v2617_v12 = vld [vmem:[#allocation8 + $0x40] sm:$0xff]  }
  0xcd   :  { %1564 = vmatprep.subr.bf16.mxu1 %v2536_v49  ;;  %v2616_v49 = vld [vmem:[#allocation8 + $0x8] sm:$0xff]  }
  0xcf   :  { %1526 = vmatpush1.bf16.msra.mxu0 %v2537_v51  ;;  %v2624_v51 = vld [vmem:[#allocation8 + $0xa8] sm:$0xff]  }
  0xd0   :  { %1565 = vmatpush1.bf16.msra.mxu1 %v2534_v50  ;;  %1527 = vmatprep.subr.bf16.mxu0 %v2545_v53  ;;  %v2618_v50 = vld [vmem:[#allocation8] sm:$0xff]  }
  0xd1   :  { %1566 = vmatprep.subr.bf16.mxu1 %v2542_v52  ;;  %v2625_v52 = vld [vmem:[#allocation8 + $0xe0] sm:$0xff]  }
  0xd2   :  { %v2626_v53 = vld [vmem:[#allocation8 + $0xa0] sm:$0xff]  }
  0xd3   :  { %1528 = vmatpush1.bf16.msra.mxu0 %v2543_v55  ;;  %v2628_v55 = vld [vmem:[#allocation8 + $0x98] sm:$0xff]  }
  0xd4   :  { %1567 = vmatpush1.bf16.msra.mxu1 %v2540_v44  ;;  %1529 = vmatprep.subr.bf16.mxu0 %v2551_v57  ;;  %v2627_v44 = vld [vmem:[#allocation8 + $0xd8] sm:$0xff]   ;;  %v2630_v57 = vld [vmem:[#allocation8 + $0x90] sm:$0xff]  }
  0xd5   :  { %1568 = vmatprep.subr.bf16.mxu1 %v2548_v56  ;;  %v2629_v56 = vld [vmem:[#allocation8 + $0xd0] sm:$0xff]  }
  0xd7   :  { %1530 = vmatpush2.bf16.msra.mxu0 %v2549_v59  ;;  %v2632_v59 = vld [vmem:[#allocation8 + $0x88] sm:$0xff]  }
  0xd8   :  { %1569 = vmatpush1.bf16.msra.mxu1 %v2546_v58  ;;  %1531 = vmatprep.subr.bf16.mxu0 %v2557_v61  ;;  %v2631_v58 = vld [vmem:[#allocation8 + $0xc8] sm:$0xff]   ;;  %v2634_v61 = vld [vmem:[#allocation8 + $0x80] sm:$0xff]  }
  0xd9   :  { %1570 = vmatprep.subr.bf16.mxu1 %v2554_v60  ;;  %v2633_v60 = vld [vmem:[#allocation8 + $0xc0] sm:$0xff]  }
  0xdb   :  { %1532 = vmatpush2.bf16.msra.mxu0 %v2555_v63  ;;  %v294_v63 = vlaneseq }
  0xdc   :  { %1571 = vmatpush1.bf16.msra.mxu1 %v2552_v62  ;;  %1533 = vmatprep.subr.bf16.mxu0 %v2563_v1 }
  0xdd   :  { %1572 = vmatprep.subr.bf16.mxu1 %v2560_v0  ;;  %v295_v1 = vshrl.u32 %v294_v63, 7 }
  0xdf   :  { %1534 = vmatpush2.bf16.msra.mxu0 %v2561_v3 }
  0xe0   :  { %1573 = vmatpush2.bf16.msra.mxu1 %v2558_v2  ;;  %1535 = vmatprep.subr.bf16.mxu0 %v2569_v5  ;;  %v296_v5 = vsub.s32 0, %v295_v1 }
  0xe1   :  { %1574 = vmatprep.subr.bf16.mxu1 %v2566_v4  ;;  %v300_v4 = vsub.s32 1, %v295_v1 }
  0xe3   :  { %1536 = vmatpush2.bf16.msra.mxu0 %v2567_v7  ;;  %v292_v7 = vld [vmem:[#allocation7] sm:$0xf] }
  0xe4   :  { %1575 = vmatpush2.bf16.msra.mxu1 %v2564_v6  ;;  %1537 = vmatprep.subr.bf16.mxu0 %v2575_v9  ;;  %v301_v9 = vrot.slane %v292_v7, %v300_v4 }
  0xe5   :  { %1576 = vmatprep.subr.bf16.mxu1 %v2572_v8 }
  0xe7   :  { %1538 = vmatpush2.bf16.msra.mxu0 %v2573_v11 }
  0xe8   :  { %1577 = vmatpush2.bf16.msra.mxu1 %v2570_v10  ;;  %1539 = vmatprep.subr.bf16.mxu0 %v2581_v15  ;;  %v297_v10 = vrot.slane %v292_v7, %v296_v5 }
  0xe9   :  { %1578 = vmatprep.subr.bf16.mxu1 %v2578_v14 }
  0xeb   :  { %1540 = vmatpush2.bf16.msra.mxu0 %v2579_v17 }
  0xec   :  { %1579 = vmatpush2.bf16.msra.mxu1 %v2576_v16  ;;  %1541 = vmatprep.subr.bf16.mxu0 %v2587_v19 }
  0xed   :  { %1580 = vmatprep.subr.bf16.mxu1 %v2584_v18 }
  0xef   :  { %1542 = vmatpush2.bf16.msra.mxu0 %v2585_v22 }
  0xf0   :  { %1581 = vmatpush2.bf16.msra.mxu1 %v2582_v20  ;;  %1543 = vmatprep.subr.bf16.mxu0 %v2593_v25 }
  0xf1   :  { %1582 = vmatprep.subr.bf16.mxu1 %v2590_v24 }
  0xf3   :  { %1544 = vmatpush2.bf16.msra.mxu0 %v2591_v28 }
  0xf4   :  { %1583 = vmatpush2.bf16.msra.mxu1 %v2588_v27  ;;  %1613 = vmatprep.subr.bf16.mxu0 %v2599_v30 }
  0xf5   :  { %1584 = vmatprep.subr.bf16.mxu1 %v2596_v29 }
  0xf6   :  { %1546 = vmatmul.mubr.bf16.vlgmr.msra.gmra.mxu0 %v2807_v13  ;;  %v2608_v13 = vld [vmem:[#allocation8 + $0x28] sm:$0xff]  }
  0xf7   :  { %1614 = vmatpush1.bf16.msra.mxu0 %v2597_v32  ;;  %1631 = vmatprep.mubr.bf16.mxu0 %v2753_v21  ;;  %v2621_v21 = vld [vmem:[#allocation8 + $0xf0] sm:$0xff]  }
  0xf8   :  { %1585 = vmatpush2.bf16.msra.mxu1 %v2594_v31  ;;  %2251 = vmatprep.subr.bf16.mxu0 %v2603_v34 }
  0xf9   :  { %1586 = vmatprep.subr.bf16.mxu1 %v2602_v33 }
  0xfc   :  { %1587 = vmatpush2.bf16.msra.mxu1 %v2600_v35 }
  0xfd   :  { %2273 = vmatprep.subr.bf16.mxu1 %v2619_v41 }
  0xfe   :  { %2217 = vmatmul.mubr.msk.bf16.vlgmr.msra.gmra.mxu0 %vm1294_vm0, %v2812_v23  ;;  %v2623_v23 = vld [vmem:[#allocation8 + $0xe8] sm:$0xff]  }
  0xff   :  { %1589 = vmatmul.mubr.bf16.vlgmr.msra.gmra.mxu1 %v2820_v26  ;;  %2252 = vmatpush3.bf16.msra.mxu0 %v2604_v36  ;;  %v2622_v26 = vld [vmem:[#allocation8 + $0xb0] sm:$0xff]  }
 0x100   :  { %2253 = vmatprep.subr.bf16.mxu0 %v2605_v37  ;;  %2274 = vmatpush3.bf16.msra.mxu1 %v2620_v42 }
 0x101   :  { %2275 = vmatprep.subr.bf16.mxu1 %v2621_v21 }
 0x103   :  { %2254 = vmatpush3.bf16.msra.mxu0 %v2606_v38 }
 0x104   :  { %2255 = vmatprep.subr.bf16.mxu0 %v2607_v39  ;;  %2276 = vmatpush3.bf16.msra.mxu1 %v2622_v26 }
 0x105   :  { %2277 = vmatprep.subr.bf16.mxu1 %v2623_v23 }
 0x107   :  { %2256 = vmatpush3.bf16.msra.mxu0 %v2608_v13 }
 0x108   :  { %2257 = vmatprep.subr.bf16.mxu0 %v2609_v40  ;;  %2278 = vmatpush3.bf16.msra.mxu1 %v2624_v51 }
 0x109   :  { %2279 = vmatprep.subr.bf16.mxu1 %v2625_v52 }
 0x10b   :  { %2258 = vmatpush3.bf16.msra.mxu0 %v2610_v43 }
 0x10c   :  { %2259 = vmatprep.subr.bf16.mxu0 %v2611_v45  ;;  %2280 = vmatpush3.bf16.msra.mxu1 %v2626_v53 }
 0x10d   :  { %2281 = vmatprep.subr.bf16.mxu1 %v2627_v44 }
 0x10f   :  { %2260 = vmatpush3.bf16.msra.mxu0 %v2612_v54 }
 0x110   :  { %2261 = vmatprep.subr.bf16.mxu0 %v2613_v46  ;;  %2282 = vmatpush3.bf16.msra.mxu1 %v2628_v55  ;;  %v308_v46 = vsub.s32 3, %v295_v1 }
 0x111   :  { %2283 = vmatprep.subr.bf16.mxu1 %v2629_v56 }
 0x113   :  { %2262 = vmatpush3.bf16.msra.mxu0 %v2614_v47  ;;  %v304_v47 = vsub.s32 2, %v295_v1 }
 0x114   :  { %2263 = vmatprep.subr.bf16.mxu0 %v2615_v48  ;;  %2284 = vmatpush3.bf16.msra.mxu1 %v2630_v57 }
 0x115   :  { %2285 = vmatprep.subr.bf16.mxu1 %v2631_v58  ;;  %v305_v51 = vrot.slane %v292_v7, %v304_v47 }
 0x117   :  { %2264 = vmatpush3.bf16.msra.mxu0 %v2616_v49 }
 0x118   :  { %2265 = vmatprep.subr.bf16.mxu0 %v2617_v12  ;;  %2286 = vmatpush3.bf16.msra.mxu1 %v2632_v59 }
 0x119   :  { %2287 = vmatprep.subr.bf16.mxu1 %v2633_v60 }
 0x11b   :  { %2266 = vmatpush3.bf16.msra.mxu0 %v2618_v50  ;;  %v309_v50 = vrot.slane %v292_v7, %v308_v46 }
 0x11c   :  { %2288 = vmatpush3.bf16.msra.mxu1 %v2634_v61 }
 0x136   :  { %v1332_v2 = vpop.f32.mrf.mxu0 }
 0x137   :  { %v1375_v62 = vpop.f32.mrf.mxu1  ;;  %v1333_v16 = vadd.f32 %v1332_v2, %v297_v10 }
 0x138   :  { %v1334_v6 = vpop.f32.mrf.mxu0 }
 0x139   :  { %v1377_v0 = vpop.f32.mrf.mxu1  ;;  %v1335_v15 = vadd.f32 %v1334_v6, %v301_v9  ;;  %v1376_v25 = vadd.f32 %v1375_v62, %v1333_v16 }
 0x13a   :  { %v1336_v11 = vpop.f32.mrf.mxu0 }
 0x13b   :  { %v1379_v3 = vpop.f32.mrf.mxu1  ;;  %v1337_v18 = vadd.f32 %v1336_v11, %v297_v10  ;;  %v1378_v22 = vadd.f32 %v1377_v0, %v1335_v15 }
 0x13c   :  { %v1338_v17 = vpop.f32.mrf.mxu0 }
 0x13d   :  { %v1381_v8 = vpop.f32.mrf.mxu1  ;;  %v1339_v24 = vadd.f32 %v1338_v17, %v301_v9  ;;  %v1380_v28 = vadd.f32 %v1379_v3, %v1337_v18 }
 0x13f   :  { %v1461_v14 = vpop.f32.mrf.mxu1  ;;  %v1382_v33 = vadd.f32 %v1381_v8, %v1339_v24 }
 0x141   :  { %v1463_v19 = vpop.f32.mrf.mxu1 }
 0x143   :  { %v1465_v30 = vpop.f32.mrf.mxu1 }
 0x145   :  { %v1467_v39 = vpop.f32.mrf.mxu1 }
 0x176   :  { %v1418_v20 = vpop.f32.mrf.mxu0 }
 0x177   :  { %v1419_v31 = vadd.f32 %v1418_v20, %v1376_v25 }
 0x178   :  { %v1420_v27 = vpop.f32.mrf.mxu0 }
 0x179   :  { %v1421_v29 = vadd.f32 %v1420_v27, %v1378_v22  ;;  %v1462_v13 = vadd.f32 %v1461_v14, %v1419_v31 }
 0x17a   :  { %v1422_v32 = vpop.f32.mrf.mxu0 }
 0x17b   :  { %v1423_v34 = vadd.f32 %v1422_v32, %v1380_v28  ;;  %v1464_v36 = vadd.f32 %v1463_v19, %v1421_v29  ;;  %v1642_v43 = vmax.f32 %v1462_v13, 0.0 }
 0x17c   :  { %v1424_v35 = vpop.f32.mrf.mxu0 }
 0x17d   :  { %v1466_v37 = vadd.f32 %v1465_v30, %v1423_v34  ;;  %v1425_v38 = vadd.f32 %v1424_v35, %v1382_v33  ;;  %v1643_v42 = vmax.f32 %v1464_v36, 0.0  ;;  %v2218_v30 = vld [vmem:[%s2841_s4] ss:$0 sm:$0xff] }
 0x17f   :  { %v1468_v40 = vadd.f32 %v1467_v39, %v1425_v38  ;;  %v1646_v41 = vmax.f32 %v1466_v37, 0.0  ;;  %v1504_v23 = vpop.f32.mrf.mxu1 }
 0x180   :  { %v1505_v56 = vadd.f32 %v1504_v23, %v305_v51 }
 0x181   :  { %v1647_v21 = vmax.f32 %v1468_v40, 0.0  ;;  %v1650_v26 = vpack.c.bf16 %v1646_v41, %v1642_v43  ;;  %v1506_v54 = vpop.f32.mrf.mxu1 }
 0x182   :  { %v1507_v55 = vadd.f32 %v1506_v54, %v309_v50 }
 0x183   :  { %v1651_v45 = vpack.c.bf16 %v1647_v21, %v1643_v42  ;;  %v1508_v49 = vpop.f32.mrf.mxu1 }
 0x184   :  { %v1509_v59 = vadd.f32 %v1508_v49, %v305_v51 }
 0x185   :  { %1949 = vmatprep.mubr.bf16.mxu0 %v1651_v45  ;;  %v1510_v53 = vpop.f32.mrf.mxu1 }
 0x186   :  { %1950 = vmatmul.mubr.bf16.vlgmr.msra.gmra.mxu0 %v1650_v26  ;;  %v1511_v0 = vadd.f32 %v1510_v53, %v309_v50 }
 0x1b6   :  { %v1547_v48 = vpop.f32.mrf.mxu0 }
 0x1b7   :  { %v1548_v61 = vadd.f32 %v1547_v48, %v1505_v56 }
 0x1b8   :  { %v1549_v12 = vpop.f32.mrf.mxu0 }
 0x1b9   :  { %v1550_v60 = vadd.f32 %v1549_v12, %v1507_v55 }
 0x1ba   :  { %v1551_v52 = vpop.f32.mrf.mxu0 }
 0x1bb   :  { %v1552_v2 = vadd.f32 %v1551_v52, %v1509_v59 }
 0x1bc   :  { %v1553_v44 = vpop.f32.mrf.mxu0 }
 0x1bd   :  { %v1554_v6 = vadd.f32 %v1553_v44, %v1511_v0 }
 0x1be   :  { %v1633_v58 = vpop.f32.mrf.mxu0 }
 0x1bf   :  { %v1590_v57 = vpop.f32.mrf.mxu1 }
 0x1c0   :  { %v1635_v63 = vpop.f32.mrf.mxu0  ;;  %v1591_v3 = vadd.f32 %v1590_v57, %v1548_v61 }
 0x1c1   :  { %v1592_v62 = vpop.f32.mrf.mxu1 }
 0x1c2   :  { %v1593_v1 = vadd.f32 %v1592_v62, %v1550_v60  ;;  %v1637_v5 = vpop.f32.mrf.mxu0  ;;  %v1634_v15 = vadd.f32 %v1633_v58, %v1591_v3 }
 0x1c3   :  { %v1594_v4 = vpop.f32.mrf.mxu1 }
 0x1c4   :  { %v1595_v7 = vadd.f32 %v1594_v4, %v1552_v2  ;;  %v1639_v9 = vpop.f32.mrf.mxu0  ;;  %v1636_v10 = vadd.f32 %v1635_v63, %v1593_v1  ;;  %v1644_v20 = vmax.f32 %v1634_v15, 0.0 }
 0x1c5   :  { %v1596_v8 = vpop.f32.mrf.mxu1 }
 0x1c6   :  { %v1638_v11 = vadd.f32 %v1637_v5, %v1595_v7  ;;  %v1597_v14 = vadd.f32 %v1596_v8, %v1554_v6  ;;  %v1645_v18 = vmax.f32 %v1636_v10, 0.0 }
 0x1c8   :  { %v1640_v16 = vadd.f32 %v1639_v9, %v1597_v14  ;;  %v1648_v17 = vmax.f32 %v1638_v11, 0.0 }
 0x1ca   :  { %v1649_v19 = vmax.f32 %v1640_v16, 0.0  ;;  %v1652_v24 = vpack.c.bf16 %v1648_v17, %v1644_v20 }
 0x1cc   :  { %v1653_v22 = vpack.c.bf16 %v1649_v19, %v1645_v18 }
 0x1ce   :  { %1990 = vmatprep.mubr.bf16.mxu1 %v1653_v22 }
 0x1cf   :  { %1991 = vmatmul.mubr.bf16.vlgmr.msra.gmra.mxu1 %v1652_v24 }
 0x246   :  { %v2267_v25 = vpop.f32.mrf.mxu0 }
 0x248   :  { %v2268_v27 = vpop.f32.mrf.mxu0 }
 0x249   :  { %v2269_v29 = vadd.f32 %v2268_v27, %v2267_v25 }
 0x24a   :  { %v2270_v28 = vpop.f32.mrf.mxu0 }
 0x24b   :  { %v1952_v34 = vadd.f32 %v2269_v29, %v2218_v30 }
 0x24c   :  { %v2271_v31 = vpop.f32.mrf.mxu0 }
 0x24d   :  { %v2272_v35 = vadd.f32 %v2271_v31, %v2270_v28 }
 0x24f   :  { %v1955_v13 = vadd.f32 %v2272_v35, %v2218_v30 }
 0x28f   :  { %v2289_v32 = vpop.f32.mrf.mxu1 }
 0x291   :  { %v2290_v33 = vpop.f32.mrf.mxu1 }
 0x292   :  { %v2291_v36 = vadd.f32 %v2290_v33, %v2289_v32 }
 0x293   :  { %v2292_v37 = vpop.f32.mrf.mxu1 }
 0x294   :  { %v1993_v38 = vadd.f32 %v2291_v36, %v1952_v34 }
 0x295   :  { %v2293_v39 = vpop.f32.mrf.mxu1 }
 0x296   :  { %1999 = vst [vmem:[#allocation10] sm:$0xff] %v1993_v38  ;;  %v2294_v40 = vadd.f32 %v2293_v39, %v2292_v37 }
 0x298   :  { %v1996_v41 = vadd.f32 %v2294_v40, %v1955_v13 }
 0x29a   :  { %2000 = vst [vmem:[#allocation10 + $0x8] sm:$0xff] %v1996_v41 }
 0x29b   :  { %2726 = shalt.err (!%p2723_p10)
}
 0x29c   :  { %s2755_s4 = smov 128   ;;  %s2756_s20 = smov 8  }
 0x29d   :  { %2012 = dma.vmem_to_hbm [thread:$0]  %s2007_s18, 256, %s2842_s5, [#allocation4], %s2755_s4, %s2755_s4, %s2756_s20  }
 0x29e   :  { %2741 = dma.done.wait [#allocation4], 256  }
 0x29f   :  { %2742 = vsyncadd [#allocation4], 4294967040 }
 0x2a0   :  { %2016 = vsyncpa [#allocation3], 1 }
 0x2a1   :  { %2017 = vsyncpa [#allocation6], 1 }
 0x2a2   :  { %2018 = vsyncpa [#allocation9], 1 }
 0x2a3   :  { %2019 = vsyncpa [#allocation4], 1 }

</bundles_post_ra>
